<compile_context>
chip_gen: v5e
topology: v5e:2x2
jax: 0.10.0
libtpu: 0.0.40
codegen_flags: <defaults>
</compile_context>

<pallas_src>
import functools

import jax
import jax.numpy as jnp
from jax.experimental import pallas as pl
from jax.experimental.pallas import tpu as pltpu


def _onehot_kernel(lab_ref, out_ref, *, n_classes, smooth, ignore_idx):
    # lab_ref: (bn, 1, tile) int32 in VMEM
    # out_ref: (bn, n_classes, tile) float32 in VMEM
    lbl = lab_ref[...]                                       # (bn, 1, tile)
    bn, _, tile = lbl.shape
    cls = jax.lax.broadcasted_iota(jnp.int32, (bn, n_classes, tile), 1)
    pos = jnp.float32(1.0 - smooth)
    neg = jnp.float32(smooth / n_classes)
    oh = jnp.where(cls == lbl, pos, neg)                     # (bn, C, tile)
    oh = jnp.where(lbl == ignore_idx, jnp.float32(0.0), oh)  # ignore -> zeros
    out_ref[...] = oh


def _largest_divisor_leq(x, cap):
    cap = max(1, min(x, cap))
    for d in range(cap, 0, -1):
        if x % d == 0:
            return d
    return 1


def onehot_encode(label, n_classes, lb_smooth=0.0, ignore_idx=-1, *,
                  max_tile_lanes=4096, target_elems_per_step=8192,
                  max_block_bytes=4 * 1024 * 1024):
    """label: int array of shape (N, ...). Returns float32 (N, n_classes, ...)."""
    n_classes = int(n_classes)
    label = label.astype(jnp.int32)
    in_shape = label.shape
    n = int(in_shape[0])
    spatial = in_shape[1:]
    s = 1
    for d in spatial:
        s *= int(d)

    # --- choose lane tile: a 128-multiple divisor of round_up(S,128), so we
    # never pad beyond the next 128 boundary (and pad nothing if S%128==0).
    s128 = pl.cdiv(s, 128) * 128
    lane_blocks = s128 // 128
    # cap lane width by both the user cap and a VMEM budget for one out block
    lanes_cap_vmem = max(1, max_block_bytes // (4 * n_classes * 128))
    k_cap = max(1, min(max_tile_lanes // 128, lanes_cap_vmem))
    k = _largest_divisor_leq(lane_blocks, k_cap)
    tile = 128 * k
    s_pad = s128  # tile divides s128 exactly

    # --- choose batch block: pack several rows per step when S is small so
    # each grid step still writes a large, lane-dense slab.
    bn_cap_elems = max(1, target_elems_per_step // tile)
    bn_cap_vmem = max(1, max_block_bytes // (4 * n_classes * tile))
    bn = _largest_divisor_leq(n, min(bn_cap_elems, bn_cap_vmem))

    lab2d = label.reshape(n, s)
    if s_pad != s:
        # pad only the spatial tail with ignore_idx (those columns are sliced off)
        lab2d = jnp.pad(lab2d, ((0, 0), (0, s_pad - s)),
                        constant_values=ignore_idx)
    lab3d = lab2d.reshape(n, 1, s_pad)  # lane-contiguous strips per DMA

    kernel = functools.partial(
        _onehot_kernel,
        n_classes=n_classes,
        smooth=float(lb_smooth),
        ignore_idx=int(ignore_idx),
    )

    out = pl.pallas_call(
        kernel,
        out_shape=jax.ShapeDtypeStruct((n, n_classes, s_pad), jnp.float32),
        grid_spec=pltpu.PrefetchScalarGridSpec(
            num_scalar_prefetch=0,
            grid=(n // bn, s_pad // tile),
            in_specs=[pl.BlockSpec((bn, 1, tile), lambda i, j: (i, 0, j))],
            out_specs=pl.BlockSpec((bn, n_classes, tile), lambda i, j: (i, 0, j)),
        ),
        compiler_params=pltpu.CompilerParams(
            dimension_semantics=("parallel", "parallel")
        ),
    )(lab3d)

    if s_pad != s:
        out = out[:, :, :s]
    return out.reshape((n, n_classes) + tuple(spatial))


class OnehotEncoder:
    def __init__(self, n_classes, lb_smooth=0.0, ignore_idx=-1):
        self.n_classes = n_classes
        self.lb_smooth = lb_smooth
        self.ignore_idx = ignore_idx

    def __call__(self, label):
        return onehot_encode(label, self.n_classes, self.lb_smooth, self.ignore_idx)


def _reference(label, n_classes, lb_smooth, ignore_idx):
    pos = 1.0 - lb_smooth
    neg = lb_smooth / n_classes
    shape = label.shape
    cls = jnp.arange(n_classes, dtype=jnp.int32).reshape(
        (1, n_classes) + (1,) * (len(shape) - 1))
    lbl = jnp.expand_dims(label.astype(jnp.int32), 1)
    ref = jnp.where(cls == lbl, pos, neg)
    ref = jnp.where(lbl == ignore_idx, 0.0, ref).astype(jnp.float32)
    return ref


if __name__ == "__main__":
    n_classes = 19
    lb_smooth = 0.1
    ignore_idx = -1
    enc = OnehotEncoder(n_classes, lb_smooth, ignore_idx)

    # Case 1: spatial size is a multiple of 128 (no pad, no post-slice copy).
    N, H, W = 2, 16, 16
    label = jax.random.randint(jax.random.PRNGKey(0), (N, H, W),
                               minval=0, maxval=n_classes, dtype=jnp.int32)
    ignore_mask = jax.random.bernoulli(jax.random.PRNGKey(1), 0.1, (N, H, W))
    label = jnp.where(ignore_mask, jnp.int32(ignore_idx), label)

    out = jax.block_until_ready(enc(label))
    ref = _reference(label, n_classes, lb_smooth, ignore_idx)
    assert out.shape == (N, n_classes, H, W)
    assert out.dtype == jnp.float32
    assert jnp.allclose(out, ref, atol=1e-6)

    # Case 2: ragged spatial size (exercises the pad-to-128 + slice path).
    label2 = jax.random.randint(jax.random.PRNGKey(2), (2, 5, 7),
                                minval=0, maxval=n_classes, dtype=jnp.int32)
    label2 = label2.at[0, 0, 0].set(ignore_idx)
    out2 = jax.block_until_ready(enc(label2))
    ref2 = _reference(label2, n_classes, lb_smooth, ignore_idx)
    assert out2.shape == (2, n_classes, 5, 7)
    assert jnp.allclose(out2, ref2, atol=1e-6)

    # Case 3: 1-D labels (no spatial dims at all).
    label3 = jax.random.randint(jax.random.PRNGKey(3), (6,),
                                minval=0, maxval=n_classes, dtype=jnp.int32)
    out3 = jax.block_until_ready(enc(label3))
    ref3 = _reference(label3, n_classes, lb_smooth, ignore_idx)
    assert out3.shape == (6, n_classes)
    assert jnp.allclose(out3, ref3, atol=1e-6)

    print("KERNEL_OK")
</pallas_src>

<mosaic_0001>
module attributes {stable_mosaic.version = 11 : i64} {
  func.func @_onehot_kernel(%arg0: i32, %arg1: i32, %arg2: memref<2x1x256xi32, #tpu.memory_space<vmem>>, %arg3: memref<2x19x256xf32, #tpu.memory_space<vmem>>) attributes {dimension_semantics = [#tpu.dimension_semantics<parallel>, #tpu.dimension_semantics<parallel>], iteration_bounds = array<i64: 1, 1>, scalar_prefetch = 0 : i64, scratch_operands = 0 : i64, tpu.core_type = #tpu.core_type<tc>, window_params = [{transform_indices = @transform_0, window_bounds = array<i64: 2, 1, 256>}, {transform_indices = @transform_1, window_bounds = array<i64: 2, 19, 256>}]} {
    %c0 = arith.constant 0 : index
    %c0_0 = arith.constant 0 : index
    %c0_1 = arith.constant 0 : index
    %0 = vector.load %arg2[%c0, %c0_0, %c0_1] : memref<2x1x256xi32, #tpu.memory_space<vmem>>, vector<2x1x256xi32>
    %1 = tpu.iota {dimensions = array<i32: 1>} : vector<2x19x256xi32>
    %2 = vector.broadcast %0 : vector<2x1x256xi32> to vector<2x19x256xi32>
    %3 = arith.cmpi eq, %1, %2 : vector<2x19x256xi32>
    %cst = arith.constant 0.899999976 : f32
    %cst_2 = arith.constant 0.00526315812 : f32
    %4 = vector.broadcast %cst : f32 to vector<2x19x256xf32>
    %5 = vector.broadcast %cst_2 : f32 to vector<2x19x256xf32>
    %6 = arith.select %3, %4, %5 : vector<2x19x256xi1>, vector<2x19x256xf32>
    %c-1_i32 = arith.constant -1 : i32
    %7 = vector.broadcast %c-1_i32 : i32 to vector<2x1x256xi32>
    %8 = arith.cmpi eq, %0, %7 : vector<2x1x256xi32>
    %cst_3 = arith.constant 0.000000e+00 : f32
    %9 = vector.shape_cast %8 : vector<2x1x256xi1> to vector<2x1x256xi1>
    %10 = vector.broadcast %9 : vector<2x1x256xi1> to vector<2x19x256xi1>
    %11 = vector.broadcast %cst_3 : f32 to vector<2x19x256xf32>
    %12 = arith.select %10, %11, %6 : vector<2x19x256xi1>, vector<2x19x256xf32>
    %c0_4 = arith.constant 0 : index
    %c0_5 = arith.constant 0 : index
    %c0_6 = arith.constant 0 : index
    %13 = vector.load %arg3[%c0_4, %c0_5, %c0_6] : memref<2x19x256xf32, #tpu.memory_space<vmem>>, vector<2x19x256xf32>
    tpu.vector_store %arg3[%c0_4, %c0_5, %c0_6], %12 {strides = array<i32>} : memref<2x19x256xf32, #tpu.memory_space<vmem>>, vector<2x19x256xf32>,
    return
  }
  func.func @transform_0(%arg0: i32, %arg1: i32) -> (i32, i32, i32) {
    %c0_i32 = arith.constant 0 : i32
    %c0_i32_0 = arith.constant 0 : i32
    return %arg0, %c0_i32, %arg1 : i32, i32, i32
  }
  func.func @transform_1(%arg0: i32, %arg1: i32) -> (i32, i32, i32) {
    %c0_i32 = arith.constant 0 : i32
    %c0_i32_0 = arith.constant 0 : i32
    return %arg0, %c0_i32, %arg1 : i32, i32, i32
  }
}

</mosaic_0001>

<bundles_post_ra>
// kernel: tpu_custom_call.1
= control target key start
LH: loop header
LB: loop body
LE: loop exit
PB: predicated region body
PF: predicated region fallthrough
CT: control target
= control target key end

     0   :  { %6 = vsyncpa [#allocation3], 0  ;;  %s130_s9 = smov [#allocation2]   ;;  %s131_s11 = smov 32   ;;  %s225_s0 = inlined_call_operand.hbm [shape: s32[2,1,256], index: 0, kind: input, shape index: {}]   ;;  %s226_s1 = inlined_call_operand.vmem [shape: f32[2,19,256], index: 1, kind: output, shape index: {}]  }
   0x1   :  { %s11_s8 = sshll.u32 %s225_s0, 4  ;;  %s13_s10 = sshll.u32 %s130_s9, 4  ;;  %s12_s8 = int_to_ptr.hbm [resolvable:$true] %s11_s8  ;;  %s14_s10 = int_to_ptr.vmem [resolvable:$true] %s13_s10 }
   0x2   :  { %s132_s12 = smov 2  }
   0x3   :  { %19 = dma.hbm_to_vmem [thread:$0]  %s12_s8, 64, %s14_s10, [#allocation3], %s131_s11, %s131_s11, %s132_s12  }
   0x4   :  { %128 = dma.done.wait [#allocation3], 64  }
   0x5   :  { %129 = vsyncadd [#allocation3], 4294967232  ;;  %v26_v0 = vlaneseq  ;;  %v24_v2 = vld [vmem:[#allocation2] sm:$0x3]  ;;  %v25_v4 = vld [vmem:[#allocation2 + $0x2] sm:$0x3] }
   0x6   :  { %v30_v5 = vperm.slane %v24_v2, 0  ;;  %vm58_vm0 = vcmp.eq.s32.totalorder %v24_v2, 4294967295  ;;  %v31_v6 = vperm.slane %v24_v2, 1  ;;  %v133_v8 = vmov 0  }
   0x7   :  { %v27_v1 = vshrl.u32 %v26_v0, 7  ;;  %v60_v9 = vsel %vm58_vm0, 1, %v133_v8  ;;  %v32_v10 = vperm.slane %v25_v4, 0  ;;  %vm59_vm1 = vcmp.eq.s32.totalorder %v25_v4, 4294967295 }
   0x8   :  { %v33_v11 = vperm.slane %v25_v4, 1  ;;  %v62_v12 = vperm.slane %v60_v9, 0  ;;  %v63_v13 = vperm.slane %v60_v9, 1  ;;  %v134_v14 = vmov 0.005263158  }
   0x9   :  { %v28_v3 = vadd.s32 8, %v27_v1  ;;  %v29_v7 = vadd.s32 16, %v27_v1  ;;  %vm34_vm2 = vcmp.eq.s32.totalorder %v27_v1, %v30_v5  ;;  %vm35_vm3 = vcmp.eq.s32.totalorder %v27_v1, %v31_v6 }
   0xa   :  { %v46_v15 = vsel %vm34_vm2, 0.9, %v134_v14  ;;  %v47_v16 = vsel %vm35_vm3, 0.9, %v134_v14  ;;  %vm148_vm6 = vcmp.eq.s32.totalorder %v62_v12, 1  ;;  %vm152_vm7 = vcmp.eq.s32.totalorder %v63_v13, 1 }
   0xb   :  { %vm36_vm4 = vcmp.eq.s32.totalorder %v28_v3, %v30_v5  ;;  %vm37_vm5 = vcmp.eq.s32.totalorder %v28_v3, %v31_v6  ;;  %v70_v21 = vsel %vm148_vm6, 0.0, %v46_v15  ;;  %v71_v22 = vsel %vm152_vm7, 0.0, %v47_v16 }
   0xc   :  { %v48_v19 = vsel %vm36_vm4, 0.9, %v134_v14  ;;  %v49_v20 = vsel %vm37_vm5, 0.9, %v134_v14  ;;  %82 = vst [vmem:[%s226_s1] sm:$0xff] %v70_v21  ;;  %vm38_vm8 = vcmp.eq.s32.totalorder %v29_v7, %v30_v5  ;;  %vm39_vm9 = vcmp.eq.s32.totalorder %v29_v7, %v31_v6 }
   0xd   :  { %v72_v23 = vsel %vm148_vm6, 0.0, %v48_v19  ;;  %v73_v24 = vsel %vm152_vm7, 0.0, %v49_v20  ;;  %vm40_vm10 = vcmp.eq.s32.totalorder %v27_v1, %v32_v10  ;;  %v61_v25 = vsel %vm59_vm1, 1, %v133_v8  ;;  %83 = vst [vmem:[%s226_s1 + $0x8] sm:$0xff] %v71_v22 }
   0xe   :  { %v50_v26 = vsel %vm38_vm8, 0.9, %v134_v14  ;;  %v51_v27 = vsel %vm39_vm9, 0.9, %v134_v14  ;;  %v64_v28 = vperm.slane %v61_v25, 0  ;;  %vm41_vm11 = vcmp.eq.s32.totalorder %v27_v1, %v33_v11  ;;  %84 = vst [vmem:[%s226_s1 + $0x10] sm:$0xff] %v72_v23 }
   0xf   :  { %v74_v29 = vsel %vm148_vm6, 0.0, %v50_v26  ;;  %v75_v30 = vsel %vm152_vm7, 0.0, %v51_v27  ;;  %v52_v31 = vsel %vm40_vm10, 0.9, %v134_v14  ;;  %v65_v32 = vperm.slane %v61_v25, 1  ;;  %85 = vst [vmem:[%s226_s1 + $0x18] sm:$0xff] %v73_v24 }
  0x10   :  { %vm181_vm12 = vcmp.eq.s32.totalorder %v64_v28, 1  ;;  %v53_v34 = vsel %vm41_vm11, 0.9, %v134_v14  ;;  %vm42_vm13 = vcmp.eq.s32.totalorder %v28_v3, %v32_v10  ;;  %vm43_vm14 = vcmp.eq.s32.totalorder %v28_v3, %v33_v11  ;;  %86 = vst [vmem:[%s226_s1 + $0x20] sm:$0x7] %v74_v29 }
  0x11   :  { %v76_v35 = vsel %vm181_vm12, 0.0, %v52_v31  ;;  %vm190_vm15 = vcmp.eq.s32.totalorder %v65_v32, 1  ;;  %v54_v37 = vsel %vm42_vm13, 0.9, %v134_v14  ;;  %vm44_vm0 = vcmp.eq.s32.totalorder %v29_v7, %v32_v10  ;;  %87 = vst [vmem:[%s226_s1 + $0x28] sm:$0x7] %v75_v30 }
  0x12   :  { %v77_v38 = vsel %vm190_vm15, 0.0, %v53_v34  ;;  %v78_v39 = vsel %vm181_vm12, 0.0, %v54_v37  ;;  %v55_v40 = vsel %vm43_vm14, 0.9, %v134_v14  ;;  %vm45_vm1 = vcmp.eq.s32.totalorder %v29_v7, %v33_v11  ;;  %88 = vst [vmem:[%s226_s1 + $0x30] sm:$0xff] %v76_v35 }
  0x13   :  { %v79_v41 = vsel %vm190_vm15, 0.0, %v55_v40  ;;  %v56_v42 = vsel %vm44_vm0, 0.9, %v134_v14  ;;  %v57_v43 = vsel %vm45_vm1, 0.9, %v134_v14  ;;  %89 = vst [vmem:[%s226_s1 + $0x38] sm:$0xff] %v77_v38 }
  0x14   :  { %v80_v44 = vsel %vm181_vm12, 0.0, %v56_v42  ;;  %90 = vst [vmem:[%s226_s1 + $0x40] sm:$0xff] %v78_v39  ;;  %v81_v45 = vsel %vm190_vm15, 0.0, %v57_v43 }
  0x15   :  { %91 = vst [vmem:[%s226_s1 + $0x48] sm:$0xff] %v79_v41 }
  0x16   :  { %92 = vst [vmem:[%s226_s1 + $0x50] sm:$0x7] %v80_v44 }
  0x17   :  { %93 = vst [vmem:[%s226_s1 + $0x58] sm:$0x7] %v81_v45 }
  0x18   :  { %98 = vsyncpa [#allocation3], 1 }

</bundles_post_ra>
